<compile_context>
chip_gen: v7x
topology: tpu7x:2x2x1
jax: 0.10.0
libtpu: 0.0.40
codegen_flags: <defaults>
</compile_context>

<pallas_src>
import functools

import jax
import jax.numpy as jnp
from jax import lax
from jax.experimental import pallas as pl
from jax.experimental.pallas import tpu as pltpu

_BN_EPS = 1e-5


def _resblock_kernel(g_ref, r_ref, w_ref, scale_ref, bias_ref, out_ref, scr_ref,
                     *, cout, tb, has_skip):
    """One block of `tb` batch elements per grid step.

    g_ref, r_ref : (tb, Cin, L)      raw NCL inputs (no pre-padding)
    w_ref        : (2, M, Cin)       per-branch dense packed weights,
                                     rows = [tap0 ; tap2 ; tap1 ; (skip)]
    scale_ref    : (2, Cout, 1)      folded eval-BN scale  [e-branch ; g-branch]
    bias_ref     : (2, Cout, 1)      folded eval-BN bias
    out_ref      : (tb, 2*Cout, L)   fused output  [g branch rows ; r branch rows]
    scr_ref      : (2, 2*Cout, L+2)  zero-edged scratch used to shift tap0/tap2
                                     partial products by +/-1 lane (conv halo)
    """
    L = out_ref.shape[2]
    cdt = w_ref.dtype                      # MXU input dtype (f32 or bf16)

    # Zero the halo columns (0 and L+1) once per step; per-element writes below
    # only touch columns [1, L], so the edges stay zero.
    zcol = jnp.zeros((2, 2 * cout, 1), jnp.float32)
    scr_ref[:, :, 0:1] = zcol
    scr_ref[:, :, L + 1:L + 2] = zcol

    # Grid-invariant operands: load once per step, reuse across the batch loop.
    w_e, w_g = w_ref[0], w_ref[1]
    sc_e, sc_g = scale_ref[0], scale_ref[1]
    bi_e, bi_g = bias_ref[0], bias_ref[1]

    def branch(x, wmat, sc, bi, slot):
        # x: (Cin, L) f32, tile-aligned.  One dense MXU matmul for all taps (+skip).
        y = jnp.dot(wmat, x.astype(cdt),
                    preferred_element_type=jnp.float32)          # (M, L)
        # taps 0 and 2 need a +/-1 lane shift with a zero halo -> route them
        # through the zero-edged scratch (reviewer option (a), output side).
        scr_ref[slot, :, 1:1 + L] = y[0:2 * cout, :]             # [P0 ; P2]
        p0 = scr_ref[slot, 0:cout, 0:L]                          # W0 @ x[:, l-1]
        p2 = scr_ref[slot, cout:2 * cout, 2:2 + L]               # W2 @ x[:, l+1]
        conv = p0 + y[2 * cout:3 * cout, :] + p2                 # full conv3 output
        # Folded eval BatchNorm + ReLU; Dropout(eval) = identity.
        act = jnp.maximum(conv * sc + bi, 0.0)
        res = y[3 * cout:4 * cout, :] if has_skip else x         # 1x1 skip / identity
        return (act + res).astype(out_ref.dtype)

    def body(t, carry):
        out_ref[t, 0:cout, :] = branch(g_ref[t], w_e, sc_e, bi_e, 0)
        out_ref[t, cout:2 * cout, :] = branch(r_ref[t], w_g, sc_g, bi_g, 1)
        return carry

    lax.fori_loop(0, tb, body, 0, unroll=True)


# ------------------------- one-time parameter packing -----------------------
def _fold_batchnorm(bn):
    gamma, beta, mean, var = bn
    s = gamma / jnp.sqrt(var + _BN_EPS)
    return s, beta - mean * s


def pack_resblock_params(params, *, matmul_dtype=jnp.float32):
    """Fold eval-BN and pack conv(+skip) weights once per parameter set."""
    we, wg = params["we"], params["wg"]               # (Cout, Cin, 3) PyTorch layout
    cout = we.shape[0]

    se, be = _fold_batchnorm(params["bn_e"])
    sg, bg = _fold_batchnorm(params["bn_g"])
    scale = jnp.stack([se, sg]).reshape(2, cout, 1).astype(jnp.float32)
    bias = jnp.stack([be, bg]).reshape(2, cout, 1).astype(jnp.float32)

    def pack(w, wskip):
        rows = [w[:, :, 0], w[:, :, 2], w[:, :, 1]]   # [tap0 ; tap2 ; tap1]
        if wskip is not None:
            rows.append(wskip[:, :, 0])               # 1x1 skip conv
        return jnp.concatenate(rows, axis=0)          # (3|4 * Cout, Cin), dense

    w_packed = jnp.stack([pack(we, params["wse"]),
                          pack(wg, params["wsg"])]).astype(matmul_dtype)
    return {"w": w_packed, "scale": scale, "bias": bias}


def _choose_batch_tile(B, cin, cout, L, *, act_budget_bytes=16 << 20):
    """Batch elements per grid step: VMEM-capped, >=2 grid steps when B >= 2."""
    per_elem = (2 * cin + 2 * cout) * L * 4 * 2       # in+out blocks, double-buffered
    tb = max(1, min(B, act_budget_bytes // max(per_elem, 1)))
    if B >= 2:
        tb = min(tb, max(1, B // 2))                  # v7x: keep both TCs busy
    tb = max(1, min(tb, 8))                           # bound in-kernel unroll
    while B % tb:                                     # avoid ragged trailing block
        tb -= 1
    return tb


# ------------------------------ fused forward --------------------------------
@jax.jit
def resblock_forward(g_ncl, r_ncl, packed):
    """g_ncl, r_ncl: (B, Cin, L) float32 (PyTorch NCL layout). Returns NCL outputs."""
    B, cin, L = g_ncl.shape
    w, scale, bias = packed["w"], packed["scale"], packed["bias"]
    m_rows = w.shape[1]
    cout = scale.shape[1]
    has_skip = (m_rows == 4 * cout)                   # static (shapes)
    if not has_skip:
        assert cin == cout                            # identity residual

    tb = _choose_batch_tile(B, cin, cout, L)
    grid = (B // tb,)

    # VMEM plan derived from the actual block sizes (v7x: 64 MiB / TC).
    block_bytes = (2 * (tb * cin * L) * 4 * 2                     # g, r blocks (2x buf)
                   + tb * 2 * cout * L * 4 * 2                    # fused output block
                   + 2 * w.size * w.dtype.itemsize                # packed weights
                   + 2 * (scale.size + bias.size) * 4             # BN scale/bias
                   + 2 * 2 * cout * (L + 2) * 4)                  # shift scratch
    vmem_limit = int(min(64 << 20, max(2 * block_bytes + (4 << 20), 16 << 20)))

    kernel = functools.partial(_resblock_kernel,
                               cout=cout, tb=tb, has_skip=has_skip)

    flops = B * (2 * 2 * m_rows * cin * L + 12 * cout * L)
    bytes_accessed = (4 * (g_ncl.size + r_ncl.size + B * 2 * cout * L)
                      + w.size * w.dtype.itemsize
                      + 4 * (scale.size + bias.size))

    out = pl.pallas_call(
        kernel,
        out_shape=jax.ShapeDtypeStruct((B, 2 * cout, L), jnp.float32),
        grid_spec=pltpu.PrefetchScalarGridSpec(
            num_scalar_prefetch=0,
            grid=grid,
            in_specs=[
                pl.BlockSpec((tb, cin, L), lambda b: (b, 0, 0)),        # g
                pl.BlockSpec((tb, cin, L), lambda b: (b, 0, 0)),        # r
                # TODO(synk): mark the three grid-invariant operands below as
                # single-buffered (pipeline_mode=pl.Buffered(1)) to reclaim VMEM.
                pl.BlockSpec((2, m_rows, cin), lambda b: (0, 0, 0)),    # packed W
                pl.BlockSpec((2, cout, 1), lambda b: (0, 0, 0)),        # BN scale
                pl.BlockSpec((2, cout, 1), lambda b: (0, 0, 0)),        # BN bias
            ],
            out_specs=pl.BlockSpec((tb, 2 * cout, L), lambda b: (b, 0, 0)),
            scratch_shapes=[pltpu.VMEM((2, 2 * cout, L + 2), jnp.float32)],
        ),
        compiler_params=pltpu.CompilerParams(
            dimension_semantics=("parallel",),
            vmem_limit_bytes=vmem_limit),
        cost_estimate=pl.CostEstimate(flops=int(flops), transcendentals=0,
                                      bytes_accessed=int(bytes_accessed)),
    )(g_ncl, r_ncl, w, scale, bias)

    # Fused output -> the module's two outputs (g branch, r branch).
    return out[:, :cout, :], out[:, cout:, :]


# --------------------------- pure-JAX reference ------------------------------
def _reference_forward(g, r, params):
    def conv3(x, w):                                  # x (B,Cin,L), w (Cout,Cin,3)
        L = x.shape[2]
        xp = jnp.pad(x, ((0, 0), (0, 0), (1, 1)))
        return sum(jnp.einsum("bcl,oc->bol", xp[:, :, k:k + L], w[:, :, k])
                   for k in range(3))

    def bn(x, p):
        gamma, beta, mean, var = p
        s = gamma / jnp.sqrt(var + _BN_EPS)
        return x * s[None, :, None] + (beta - mean * s)[None, :, None]

    g_act = jnp.maximum(bn(conv3(g, params["we"]), params["bn_e"]), 0.0)
    r_act = jnp.maximum(bn(conv3(r, params["wg"]), params["bn_g"]), 0.0)
    if params["wse"] is not None:
        g_res = jnp.einsum("bcl,oc->bol", g, params["wse"][:, :, 0])
        r_res = jnp.einsum("bcl,oc->bol", r, params["wsg"][:, :, 0])
    else:
        g_res, r_res = g, r
    return g_act + g_res, r_act + r_res


def make_params(key, cin, cout):
    """Parameters in PyTorch layout: conv weights (Cout, Cin, K), BN as raw stats."""
    ks = jax.random.split(key, 6)
    K = 3
    bound3 = (6.0 / (cin * K + cout * K)) ** 0.5      # xavier_uniform_
    we = jax.random.uniform(ks[0], (cout, cin, K), jnp.float32, -bound3, bound3)
    wg = jax.random.uniform(ks[1], (cout, cin, K), jnp.float32, -bound3, bound3)
    if cin != cout:
        bound1 = (6.0 / (cin + cout)) ** 0.5
        wse = jax.random.uniform(ks[2], (cout, cin, 1), jnp.float32, -bound1, bound1)
        wsg = jax.random.uniform(ks[3], (cout, cin, 1), jnp.float32, -bound1, bound1)
    else:
        wse = None                                    # skip conv is None -> identity
        wsg = None

    def bn(k):
        kk = jax.random.split(k, 4)
        gamma = 1.0 + 0.1 * jax.random.normal(kk[0], (cout,), jnp.float32)
        beta = 0.1 * jax.random.normal(kk[1], (cout,), jnp.float32)
        mean = 0.1 * jax.random.normal(kk[2], (cout,), jnp.float32)
        var = jnp.abs(1.0 + 0.1 * jax.random.normal(kk[3], (cout,), jnp.float32))
        return (gamma, beta, mean, var)

    return dict(we=we, wg=wg, wse=wse, wsg=wsg, bn_e=bn(ks[4]), bn_g=bn(ks[5]))


if __name__ == "__main__":
    key = jax.random.PRNGKey(0)
    k_g, k_r, k_p, k_p2 = jax.random.split(key, 4)

    # Case 1: input_size != output_size (1x1 skip convs present); B=2 -> grid=(2,)
    B, Cin, Cout, L = 2, 4, 8, 16
    g = jax.random.normal(k_g, (B, Cin, L), jnp.float32)     # PyTorch NCL layout
    r = jax.random.normal(k_r, (B, Cin, L), jnp.float32)
    params = make_params(k_p, Cin, Cout)
    packed = pack_resblock_params(params)                    # one-time packing

    g_out, r_out = resblock_forward(g, r, packed)
    jax.block_until_ready((g_out, r_out))
    g_ref, r_ref = _reference_forward(g, r, params)
    assert g_out.shape == (B, Cout, L) and r_out.shape == (B, Cout, L)
    assert jnp.allclose(g_out, g_ref, atol=1e-4, rtol=1e-5)
    assert jnp.allclose(r_out, r_ref, atol=1e-4, rtol=1e-5)

    # Case 2: input_size == output_size (identity residual); B=4 exercises tb=2
    B2, Cin2, Cout2 = 4, 8, 8
    g2 = jax.random.normal(k_g, (B2, Cin2, L), jnp.float32)
    r2 = jax.random.normal(k_r, (B2, Cin2, L), jnp.float32)
    params2 = make_params(k_p2, Cin2, Cout2)
    packed2 = pack_resblock_params(params2)

    g_out2, r_out2 = resblock_forward(g2, r2, packed2)
    jax.block_until_ready((g_out2, r_out2))
    g_ref2, r_ref2 = _reference_forward(g2, r2, params2)
    assert jnp.allclose(g_out2, g_ref2, atol=1e-4, rtol=1e-5)
    assert jnp.allclose(r_out2, r_ref2, atol=1e-4, rtol=1e-5)

    # Case 3: optional bf16 MXU inputs (v6e/v7x fast path) -- looser tolerance.
    packed_bf16 = pack_resblock_params(params, matmul_dtype=jnp.bfloat16)
    g_out3, r_out3 = resblock_forward(g, r, packed_bf16)
    jax.block_until_ready((g_out3, r_out3))
    assert jnp.allclose(g_out3, g_ref, atol=1e-1, rtol=1e-1)
    assert jnp.allclose(r_out3, r_ref, atol=1e-1, rtol=1e-1)

    print("KERNEL_OK")
</pallas_src>

<mosaic_0001>
module attributes {stable_mosaic.version = 11 : i64} {
  func.func @_resblock_kernel(%arg0: i32, %arg1: memref<1x4x16xf32, #tpu.memory_space<vmem>>, %arg2: memref<1x4x16xf32, #tpu.memory_space<vmem>>, %arg3: memref<2x32x4xf32, #tpu.memory_space<vmem>>, %arg4: memref<2x8x1xf32, #tpu.memory_space<vmem>>, %arg5: memref<2x8x1xf32, #tpu.memory_space<vmem>>, %arg6: memref<1x16x16xf32, #tpu.memory_space<vmem>>, %arg7: memref<2x16x18xf32, #tpu.memory_space<vmem>>) attributes {dimension_semantics = [#tpu.dimension_semantics<parallel>], iteration_bounds = array<i64: 2>, scalar_prefetch = 0 : i64, scratch_operands = 1 : i64, tpu.core_type = #tpu.core_type<tc>, window_params = [{transform_indices = @transform_0, window_bounds = array<i64: 1, 4, 16>}, {transform_indices = @transform_1, window_bounds = array<i64: 1, 4, 16>}, {pipeline_mode = #tpu.pipeline_mode<synchronous>, transform_indices = @transform_2, window_bounds = array<i64: 2, 32, 4>}, {pipeline_mode = #tpu.pipeline_mode<synchronous>, transform_indices = @transform_3, window_bounds = array<i64: 2, 8, 1>}, {pipeline_mode = #tpu.pipeline_mode<synchronous>, transform_indices = @transform_4, window_bounds = array<i64: 2, 8, 1>}, {transform_indices = @transform_5, window_bounds = array<i64: 1, 16, 16>}]} {
    %cst = arith.constant 0.000000e+00 : f32
    %0 = vector.broadcast %cst : f32 to vector<2x16x1xf32>
    %c0 = arith.constant 0 : index
    %c0_0 = arith.constant 0 : index
    %c0_1 = arith.constant 0 : index
    %1 = vector.load %arg7[%c0, %c0_0, %c0_1] : memref<2x16x18xf32, #tpu.memory_space<vmem>>, vector<2x16x1xf32>
    tpu.vector_store %arg7[%c0, %c0_0, %c0_1], %0 {strides = array<i32>} : memref<2x16x18xf32, #tpu.memory_space<vmem>>, vector<2x16x1xf32>,
    %c0_2 = arith.constant 0 : index
    %c0_3 = arith.constant 0 : index
    %c17 = arith.constant 17 : index
    %2 = vector.load %arg7[%c0_2, %c0_3, %c17] : memref<2x16x18xf32, #tpu.memory_space<vmem>>, vector<2x16x1xf32>
    tpu.vector_store %arg7[%c0_2, %c0_3, %c17], %0 {strides = array<i32>} : memref<2x16x18xf32, #tpu.memory_space<vmem>>, vector<2x16x1xf32>,
    %c0_4 = arith.constant 0 : index
    %c0_5 = arith.constant 0 : index
    %c0_6 = arith.constant 0 : index
    %3 = vector.load %arg3[%c0_4, %c0_5, %c0_6] : memref<2x32x4xf32, #tpu.memory_space<vmem>>, vector<1x32x4xf32>
    %4 = vector.shape_cast %3 : vector<1x32x4xf32> to vector<32x4xf32>
    %c1 = arith.constant 1 : index
    %c0_7 = arith.constant 0 : index
    %c0_8 = arith.constant 0 : index
    %5 = vector.load %arg3[%c1, %c0_7, %c0_8] : memref<2x32x4xf32, #tpu.memory_space<vmem>>, vector<1x32x4xf32>
    %6 = vector.shape_cast %5 : vector<1x32x4xf32> to vector<32x4xf32>
    %c0_9 = arith.constant 0 : index
    %c0_10 = arith.constant 0 : index
    %c0_11 = arith.constant 0 : index
    %7 = vector.load %arg4[%c0_9, %c0_10, %c0_11] : memref<2x8x1xf32, #tpu.memory_space<vmem>>, vector<1x8x1xf32>
    %8 = vector.shape_cast %7 : vector<1x8x1xf32> to vector<8x1xf32>
    %c1_12 = arith.constant 1 : index
    %c0_13 = arith.constant 0 : index
    %c0_14 = arith.constant 0 : index
    %9 = vector.load %arg4[%c1_12, %c0_13, %c0_14] : memref<2x8x1xf32, #tpu.memory_space<vmem>>, vector<1x8x1xf32>
    %10 = vector.shape_cast %9 : vector<1x8x1xf32> to vector<8x1xf32>
    %c0_15 = arith.constant 0 : index
    %c0_16 = arith.constant 0 : index
    %c0_17 = arith.constant 0 : index
    %11 = vector.load %arg5[%c0_15, %c0_16, %c0_17] : memref<2x8x1xf32, #tpu.memory_space<vmem>>, vector<1x8x1xf32>
    %12 = vector.shape_cast %11 : vector<1x8x1xf32> to vector<8x1xf32>
    %c1_18 = arith.constant 1 : index
    %c0_19 = arith.constant 0 : index
    %c0_20 = arith.constant 0 : index
    %13 = vector.load %arg5[%c1_18, %c0_19, %c0_20] : memref<2x8x1xf32, #tpu.memory_space<vmem>>, vector<1x8x1xf32>
    %14 = vector.shape_cast %13 : vector<1x8x1xf32> to vector<8x1xf32>
    %c0_i32 = arith.constant 0 : i32
    %15 = arith.index_cast %c0_i32 : i32 to index
    %c0_21 = arith.constant 0 : index
    %c0_22 = arith.constant 0 : index
    %16 = vector.load %arg1[%15, %c0_21, %c0_22] : memref<1x4x16xf32, #tpu.memory_space<vmem>>, vector<1x4x16xf32>
    %17 = vector.shape_cast %16 : vector<1x4x16xf32> to vector<4x16xf32>
    %cst_23 = arith.constant dense<0.000000e+00> : vector<32x16xf32>
    %18 = tpu.matmul %4, %17, %cst_23 {dimension_numbers = #tpu.dot_dimension_numbers<[1], [0], [0], [1], [0, 0, 1, 1], [], []>} : vector<32x4xf32>, vector<4x16xf32>, vector<32x16xf32> -> vector<32x16xf32>
    %19 = vector.extract_strided_slice %18 {offsets = [0, 0], sizes = [16, 16], strides = [1, 1]} : vector<32x16xf32> to vector<16x16xf32>
    %c0_24 = arith.constant 0 : index
    %c0_25 = arith.constant 0 : index
    %c1_26 = arith.constant 1 : index
    %20 = vector.load %arg7[%c0_24, %c0_25, %c1_26] : memref<2x16x18xf32, #tpu.memory_space<vmem>>, vector<1x16x16xf32>
    %21 = vector.shape_cast %20 : vector<1x16x16xf32> to vector<16x16xf32>
    %22 = vector.shape_cast %19 : vector<16x16xf32> to vector<1x16x16xf32>
    tpu.vector_store %arg7[%c0_24, %c0_25, %c1_26], %22 {strides = array<i32>} : memref<2x16x18xf32, #tpu.memory_space<vmem>>, vector<1x16x16xf32>,
    %c0_27 = arith.constant 0 : index
    %c0_28 = arith.constant 0 : index
    %c0_29 = arith.constant 0 : index
    %23 = vector.load %arg7[%c0_27, %c0_28, %c0_29] : memref<2x16x18xf32, #tpu.memory_space<vmem>>, vector<1x8x16xf32>
    %24 = vector.shape_cast %23 : vector<1x8x16xf32> to vector<8x16xf32>
    %c0_30 = arith.constant 0 : index
    %c8 = arith.constant 8 : index
    %c2 = arith.constant 2 : index
    %25 = vector.load %arg7[%c0_30, %c8, %c2] : memref<2x16x18xf32, #tpu.memory_space<vmem>>, vector<1x8x16xf32>
    %26 = vector.shape_cast %25 : vector<1x8x16xf32> to vector<8x16xf32>
    %27 = vector.extract_strided_slice %18 {offsets = [16, 0], sizes = [8, 16], strides = [1, 1]} : vector<32x16xf32> to vector<8x16xf32>
    %28 = arith.addf %24, %27 : vector<8x16xf32>
    %29 = arith.addf %28, %26 : vector<8x16xf32>
    %30 = vector.broadcast %8 : vector<8x1xf32> to vector<8x16xf32>
    %31 = arith.mulf %29, %30 : vector<8x16xf32>
    %32 = vector.broadcast %12 : vector<8x1xf32> to vector<8x16xf32>
    %33 = arith.addf %31, %32 : vector<8x16xf32>
    %cst_31 = arith.constant 0.000000e+00 : f32
    %34 = vector.broadcast %cst_31 : f32 to vector<8x16xf32>
    %35 = arith.maximumf %33, %34 : vector<8x16xf32>
    %36 = vector.extract_strided_slice %18 {offsets = [24, 0], sizes = [8, 16], strides = [1, 1]} : vector<32x16xf32> to vector<8x16xf32>
    %37 = arith.addf %35, %36 : vector<8x16xf32>
    %38 = arith.index_cast %c0_i32 : i32 to index
    %c0_32 = arith.constant 0 : index
    %c0_33 = arith.constant 0 : index
    %39 = vector.load %arg6[%38, %c0_32, %c0_33] : memref<1x16x16xf32, #tpu.memory_space<vmem>>, vector<1x8x16xf32>
    %40 = vector.shape_cast %39 : vector<1x8x16xf32> to vector<8x16xf32>
    %41 = vector.shape_cast %37 : vector<8x16xf32> to vector<1x8x16xf32>
    tpu.vector_store %arg6[%38, %c0_32, %c0_33], %41 {strides = array<i32>} : memref<1x16x16xf32, #tpu.memory_space<vmem>>, vector<1x8x16xf32>,
    %42 = arith.index_cast %c0_i32 : i32 to index
    %c0_34 = arith.constant 0 : index
    %c0_35 = arith.constant 0 : index
    %43 = vector.load %arg2[%42, %c0_34, %c0_35] : memref<1x4x16xf32, #tpu.memory_space<vmem>>, vector<1x4x16xf32>
    %44 = vector.shape_cast %43 : vector<1x4x16xf32> to vector<4x16xf32>
    %cst_36 = arith.constant dense<0.000000e+00> : vector<32x16xf32>
    %45 = tpu.matmul %6, %44, %cst_36 {dimension_numbers = #tpu.dot_dimension_numbers<[1], [0], [0], [1], [0, 0, 1, 1], [], []>} : vector<32x4xf32>, vector<4x16xf32>, vector<32x16xf32> -> vector<32x16xf32>
    %46 = vector.extract_strided_slice %45 {offsets = [0, 0], sizes = [16, 16], strides = [1, 1]} : vector<32x16xf32> to vector<16x16xf32>
    %c1_37 = arith.constant 1 : index
    %c0_38 = arith.constant 0 : index
    %c1_39 = arith.constant 1 : index
    %47 = vector.load %arg7[%c1_37, %c0_38, %c1_39] : memref<2x16x18xf32, #tpu.memory_space<vmem>>, vector<1x16x16xf32>
    %48 = vector.shape_cast %47 : vector<1x16x16xf32> to vector<16x16xf32>
    %49 = vector.shape_cast %46 : vector<16x16xf32> to vector<1x16x16xf32>
    tpu.vector_store %arg7[%c1_37, %c0_38, %c1_39], %49 {strides = array<i32>} : memref<2x16x18xf32, #tpu.memory_space<vmem>>, vector<1x16x16xf32>,
    %c1_40 = arith.constant 1 : index
    %c0_41 = arith.constant 0 : index
    %c0_42 = arith.constant 0 : index
    %50 = vector.load %arg7[%c1_40, %c0_41, %c0_42] : memref<2x16x18xf32, #tpu.memory_space<vmem>>, vector<1x8x16xf32>
    %51 = vector.shape_cast %50 : vector<1x8x16xf32> to vector<8x16xf32>
    %c1_43 = arith.constant 1 : index
    %c8_44 = arith.constant 8 : index
    %c2_45 = arith.constant 2 : index
    %52 = vector.load %arg7[%c1_43, %c8_44, %c2_45] : memref<2x16x18xf32, #tpu.memory_space<vmem>>, vector<1x8x16xf32>
    %53 = vector.shape_cast %52 : vector<1x8x16xf32> to vector<8x16xf32>
    %54 = vector.extract_strided_slice %45 {offsets = [16, 0], sizes = [8, 16], strides = [1, 1]} : vector<32x16xf32> to vector<8x16xf32>
    %55 = arith.addf %51, %54 : vector<8x16xf32>
    %56 = arith.addf %55, %53 : vector<8x16xf32>
    %57 = vector.broadcast %10 : vector<8x1xf32> to vector<8x16xf32>
    %58 = arith.mulf %56, %57 : vector<8x16xf32>
    %59 = vector.broadcast %14 : vector<8x1xf32> to vector<8x16xf32>
    %60 = arith.addf %58, %59 : vector<8x16xf32>
    %cst_46 = arith.constant 0.000000e+00 : f32
    %61 = vector.broadcast %cst_46 : f32 to vector<8x16xf32>
    %62 = arith.maximumf %60, %61 : vector<8x16xf32>
    %63 = vector.extract_strided_slice %45 {offsets = [24, 0], sizes = [8, 16], strides = [1, 1]} : vector<32x16xf32> to vector<8x16xf32>
    %64 = arith.addf %62, %63 : vector<8x16xf32>
    %65 = arith.index_cast %c0_i32 : i32 to index
    %c8_47 = arith.constant 8 : index
    %c0_48 = arith.constant 0 : index
    %66 = vector.load %arg6[%65, %c8_47, %c0_48] : memref<1x16x16xf32, #tpu.memory_space<vmem>>, vector<1x8x16xf32>
    %67 = vector.shape_cast %66 : vector<1x8x16xf32> to vector<8x16xf32>
    %68 = vector.shape_cast %64 : vector<8x16xf32> to vector<1x8x16xf32>
    tpu.vector_store %arg6[%65, %c8_47, %c0_48], %68 {strides = array<i32>} : memref<1x16x16xf32, #tpu.memory_space<vmem>>, vector<1x8x16xf32>,
    %c1_i32 = arith.constant 1 : i32
    return
  }
  func.func @transform_0(%arg0: i32) -> (i32, i32, i32) {
    %c0_i32 = arith.constant 0 : i32
    %c0_i32_0 = arith.constant 0 : i32
    %c0_i32_1 = arith.constant 0 : i32
    return %arg0, %c0_i32, %c0_i32_0 : i32, i32, i32
  }
  func.func @transform_1(%arg0: i32) -> (i32, i32, i32) {
    %c0_i32 = arith.constant 0 : i32
    %c0_i32_0 = arith.constant 0 : i32
    %c0_i32_1 = arith.constant 0 : i32
    return %arg0, %c0_i32, %c0_i32_0 : i32, i32, i32
  }
  func.func @transform_2(%arg0: i32) -> (i32, i32, i32) {
    %c0_i32 = arith.constant 0 : i32
    %c0_i32_0 = arith.constant 0 : i32
    %c0_i32_1 = arith.constant 0 : i32
    %c0_i32_2 = arith.constant 0 : i32
    return %c0_i32, %c0_i32_0, %c0_i32_1 : i32, i32, i32
  }
  func.func @transform_3(%arg0: i32) -> (i32, i32, i32) {
    %c0_i32 = arith.constant 0 : i32
    %c0_i32_0 = arith.constant 0 : i32
    %c0_i32_1 = arith.constant 0 : i32
    %c0_i32_2 = arith.constant 0 : i32
    return %c0_i32, %c0_i32_0, %c0_i32_1 : i32, i32, i32
  }
  func.func @transform_4(%arg0: i32) -> (i32, i32, i32) {
    %c0_i32 = arith.constant 0 : i32
    %c0_i32_0 = arith.constant 0 : i32
    %c0_i32_1 = arith.constant 0 : i32
    %c0_i32_2 = arith.constant 0 : i32
    return %c0_i32, %c0_i32_0, %c0_i32_1 : i32, i32, i32
  }
  func.func @transform_5(%arg0: i32) -> (i32, i32, i32) {
    %c0_i32 = arith.constant 0 : i32
    %c0_i32_0 = arith.constant 0 : i32
    %c0_i32_1 = arith.constant 0 : i32
    return %arg0, %c0_i32, %c0_i32_0 : i32, i32, i32
  }
}

</mosaic_0001>

<bundles_post_ra>
// kernel: resblock_forward.1
= control target key start
LH: loop header
LB: loop body
LE: loop exit
PB: predicated region body
PF: predicated region fallthrough
CT: control target
= control target key end

     0   :  { %s714_s18 = smov 0   ;;  %s782_s0 = inlined_call_operand.vmem [shape: f32[2,4,16], index: 0, kind: input, shape index: {}]   ;;  %s783_s1 = inlined_call_operand.vmem [shape: f32[2,4,16], index: 1, kind: input, shape index: {}]   ;;  %s784_s2 = inlined_call_operand.vmem [shape: f32[2,32,4], index: 2, kind: input, shape index: {}]   ;;  %s785_s3 = inlined_call_operand.vmem [shape: f32[2,8,1], index: 3, kind: input, shape index: {}]   ;;  %s786_s4 = inlined_call_operand.vmem [shape: f32[2,8,1], index: 4, kind: input, shape index: {}]   ;;  %s787_s5 = inlined_call_operand.vmem [shape: f32[2,16,16], index: 5, kind: output, shape index: {}]  }
   0x1 LB: > { %s604_s19 = sadd.s32 4294967295, %s678_s18   ;;  %p608_p0 = scmp.ge.s32.totalorder %s678_s18, 1  ;;  %s678_s18 = sphi %s714_s18, %s15_s18  }
   0x2   : > { %p195_p1 = scmp.lt.s32.totalorder %s678_s18, 3 }
   0x4   : > { %p196_p2 = pnand %p608_p0, %p195_p1 }
   0x5   : > { %p226_p3 = scmp.lt.s32.totalorder (!%p196_p2), %s604_s19, 1  ;;  %v249_v0 = vld [vmem:[%s784_s2] sm:$0xff] (!%p196_p2)  ;;  %vm265_vm0 = vcmask (!%p196_p2), 31744   ;;  %vm278_vm1 = vcmask (!%p196_p2), 1043456   ;;  %v250_v3 = vld [vmem:[%s784_s2 + $0x8] sm:$0xff] (!%p196_p2)  ;;  %v251_v6 = vld [vmem:[%s784_s2 + $0x10] sm:$0xff] (!%p196_p2) }
   0x6   : > { %199 = sbr.rel (%p196_p2) target bundleno = 484 (0x1e4), region = 40  ;;  %v613_v1 = vld [vmem:[%s784_s2 + $0x20] sm:$0xff] (!%p196_p2)  ;;  %644 = vmatprep.mubr.msk.f32.mxu0 (!%p196_p2), %vm265_vm0, %v249_v0  ;;  %v614_v5 = vld [vmem:[%s784_s2 + $0x28] sm:$0xff] (!%p196_p2)  ;;  %v615_v7 = vld [vmem:[%s784_s2 + $0x30] sm:$0xff] (!%p196_p2)  ;;  %v680_v10 = vmov (!%p196_p2), 0   ;;  %vm239_vm2 = vcmask (!%p196_p2), 7168  }
   0x7   : > { %652 = vmatprep.mubr.msk.f32.mxu1 (!%p196_p2), %vm265_vm0, %v613_v1  ;;  %v252_v8 = vld [vmem:[%s784_s2 + $0x18] sm:$0xff] (!%p196_p2)  ;;  %671 = vset.pattern.permute.xlu1 (!%p196_p2), %v680_v10  ;;  %vm244_vm3 = vcmask (!%p196_p2), 146568   ;;  %v681_v11 = vmov (!%p196_p2), 0.0   ;;  %s682_s20 = smov (!%p196_p2), 1   ;;  %v258_v19 = vld [vmem:[%s785_s3] sm:$0xff] (!%p196_p2)  ;;  %v617_v21 = vld [vmem:[%s785_s3 + $0x8] sm:$0xff] (!%p196_p2) }
   0x8   : > { %v616_v9 = vld [vmem:[%s784_s2 + $0x38] sm:$0xff] (!%p196_p2)  ;;  %670 = vset.pattern.permute.xlu0 (!%p196_p2), %v680_v10  ;;  %241 = vst.msk [vmem:[#allocation2 + $0x8] sm:$0xff] (!%p196_p2), %vm239_vm2, %v681_v11  ;;  %240 = vst.msk [vmem:[#allocation2] sm:$0xff] (!%p196_p2), %vm239_vm2, %v681_v11  ;;  %v618_v22 = vld [vmem:[%s786_s4 + $0x8] sm:$0xff] (!%p196_p2)  ;;  %vm375_vm4 = vcmask (!%p196_p2), 138248   ;;  %s683_s29 = smov (!%p196_p2), 126  }
   0x9   : > { %242 = vst.msk [vmem:[#allocation2 + $0x10] sm:$0xff] (!%p196_p2), %vm239_vm2, %v681_v11  ;;  %243 = vst.msk [vmem:[#allocation2 + $0x18] sm:$0xff] (!%p196_p2), %vm239_vm2, %v681_v11  ;;  %v261_v23 = vld [vmem:[%s786_s4] sm:$0xff] (!%p196_p2)  ;;  %vm400_vm5 = vcmask (!%p196_p2), 130048  }
   0xa   : > { %246 = vst.msk [vmem:[#allocation2 + $0x8] sm:$0xff] (!%p196_p2), %vm244_vm3, %v681_v11  ;;  %245 = vst.msk [vmem:[#allocation2] sm:$0xff] (!%p196_p2), %vm244_vm3, %v681_v11 }
   0xb   : > { %247 = vst.msk [vmem:[#allocation2 + $0x10] sm:$0xff] (!%p196_p2), %vm244_vm3, %v681_v11  ;;  %248 = vst.msk [vmem:[#allocation2 + $0x18] sm:$0xff] (!%p196_p2), %vm244_vm3, %v681_v11 }
   0xd   : > { %s789_s19 = smov (!%p226_p3, %s604_s19), 1 }
   0xe   : > { %s609_s24 = sshll.u32 %s789_s19, 2  ;;  %s631_s30 = sshll.u32 %s789_s19, 4 }
   0xf   : > { %s229_s27 = scalar_lea.vmem %s782_s0, %s609_s24  ;;  %s233_s7 = scalar_lea.vmem %s783_s1, %s609_s24 }
  0x10   : > { %v264_v2 = vld [vmem:[%s229_s27] sm:$0xf]  ;;  %s238_s8 = scalar_lea.vmem %s787_s5, %s631_s30 }
  0x11   : > { %642 = vmatprep.subr.msk.mxu0 %vm278_vm1, %v264_v2  ;;  %v402_v4 = vld [vmem:[%s233_s7] sm:$0xf] }
  0x12   : > { %643 = vmatpush3.msk.msra.mxu0 %vm278_vm1, %v264_v2  ;;  %650 = vmatprep.subr.msk.mxu1 %vm278_vm1, %v402_v4 }
  0x13   : > { %645 = vmatmul.mubr.msk.f32.vlgmr.msra.gmra.mrb[0].mxu0 %vm265_vm0, %v250_v3  ;;  %651 = vmatpush3.msk.msra.mxu1 %vm278_vm1, %v402_v4 }
  0x14   : > { %653 = vmatmul.mubr.msk.f32.vlgmr.msra.gmra.mrb[0].mxu1 %vm265_vm0, %v614_v5  ;;  %647 = vmatprep.mubr.msk.f32.mxu0 %vm265_vm0, %v251_v6 }
  0x15   : > { %655 = vmatprep.mubr.msk.f32.mxu1 %vm265_vm0, %v615_v7 }
  0x17   : > { %648 = vmatmul.mubr.msk.f32.gmra.mrb[2].mxu0 %vm265_vm0, %v252_v8 }
  0x18   : > { %656 = vmatmul.mubr.msk.f32.gmra.mrb[2].mxu1 %vm265_vm0, %v616_v9 }
  0xe6   : > { %v646_v12 = vpop.f32.mrb[0].mxu0 }
  0xe7   : > { %371 = vrot.lane.b32.xlu0 %v646_v12, %s682_s20  ;;  %v348_v13 = vpop.f32.mrb[1].mxu0  ;;  %v654_v14 = vpop.f32.mrb[0].mxu1 }
  0xe8   : > { %369 = vrot.lane.b32.xlu1 %v348_v13, %s682_s20  ;;  %v484_v15 = vpop.f32.mrb[1].mxu1 }
  0xea   : > { %v649_v16 = vpop.f32.mrb[2].mxu0 }
  0xeb   : > { %507 = vrot.lane.b32.xlu0 %v654_v14, %s682_s20  ;;  %v358_v17 = vpop.f32.mrb[3].mxu0  ;;  %v657_v18 = vpop.f32.mrb[2].mxu1 }
  0xec   : > { %505 = vrot.lane.b32.xlu1 %v484_v15, %s682_s20  ;;  %v494_v20 = vpop.f32.mrb[3].mxu1 }
  0xef   : > { %388 = vperm.xlu0 %670, %v258_v19  }
  0xf0   : > { %524 = vperm.xlu1 %671, %v617_v21  }
  0xf3   : > { %530 = vperm.xlu0 %670, %v618_v22  }
  0xf4   : > { %394 = vperm.xlu1 %671, %v261_v23  }
 0x159   : > { %v372_v24 = vpop.permute.xlu0 %371 }
 0x15a   : > { %377 = vst.msk [vmem:[#allocation2 + $0x8] sm:$0xff] %vm375_vm4, %v372_v24  ;;  %v370_v25 = vpop.permute.xlu1 %369 }
 0x15b   : > { %376 = vst.msk [vmem:[#allocation2] sm:$0xff] %vm375_vm4, %v370_v25 }
 0x15d   : > { %v508_v26 = vpop.permute.xlu0 %507 }
 0x15e   : > { %513 = vst.msk [vmem:[#allocation2 + $0x18] sm:$0xff] %vm375_vm4, %v508_v26  ;;  %v506_v27 = vpop.permute.xlu1 %505 }
 0x15f   : > { %512 = vst.msk [vmem:[#allocation2 + $0x10] sm:$0xff] %vm375_vm4, %v506_v27 }
 0x161   : > { %v379_v28 = vld [vmem:[#allocation2 + $0x8] sm:$0xff] }
 0x162   : > { %382 = vrot.lane.b32.xlu1 %v379_v28, %s683_s29  ;;  %v378_v33 = vld [vmem:[#allocation2] sm:$0xff] }
 0x163   : > { %v380_v34 = vadd.f32 %v378_v33, %v358_v17 }
 0x165   : > { %v515_v29 = vld [vmem:[#allocation2 + $0x18] sm:$0xff] }
 0x166   : > { %518 = vrot.lane.b32.xlu0 %v515_v29, %s683_s29  ;;  %v514_v35 = vld [vmem:[#allocation2 + $0x10] sm:$0xff] }
 0x167   : > { %v516_v39 = vadd.f32 %v514_v35, %v494_v20 }
 0x16e   : > { %v389_v31 = vpop.permute.xlu0 %388 }
 0x16f   : > { %v525_v30 = vpop.permute.xlu1 %524 }
 0x172   : > { %v531_v36 = vpop.permute.xlu0 %530 }
 0x173   : > { %v395_v32 = vpop.permute.xlu1 %394 }
 0x1d4   : > { %v383_v37 = vpop.permute.xlu1 %382 }
 0x1d5   : > { %v385_v38 = vadd.f32 %v383_v37, %v380_v34 }
 0x1d7   : > { %v391_v40 = vmul.f32 %v389_v31, %v385_v38 }
 0x1d8   : > { %v519_v41 = vpop.permute.xlu0 %518 }
 0x1d9   : > { %v397_v42 = vadd.f32 %v395_v32, %v391_v40  ;;  %v521_v43 = vadd.f32 %v519_v41, %v516_v39 }
 0x1db   : > { %v398_v44 = vmax.f32 %v397_v42, 0.0  ;;  %v527_v45 = vmul.f32 %v525_v30, %v521_v43 }
 0x1dd   : > { %v399_v46 = vadd.f32 %v649_v16, %v398_v44  ;;  %v533_v47 = vadd.f32 %v531_v36, %v527_v45 }
 0x1df   : > { %401 = vst.msk [vmem:[%s238_s8] sm:$0xff] %vm400_vm5, %v399_v46  ;;  %v534_v48 = vmax.f32 %v533_v47, 0.0 }
 0x1e1   : > { %v535_v49 = vadd.f32 %v657_v18, %v534_v48 }
 0x1e3   : > { %536 = vst.msk [vmem:[%s238_s8 + $0x8] sm:$0xff] %vm400_vm5, %v535_v49 }
 0x1e4 PF: > { %s15_s18 = sadd.s32 1, %s678_s18  }
 0x1e5   : > { %p12_p4 = scmp.ge.s32.totalorder %s15_s18, 4  }
 0x1e7   :  { %14 = sbr.rel (!%p12_p4) target bundleno = 1 (0x1), region = 77 }

</bundles_post_ra>
